<compile_context>
chip_gen: v6e
topology: v6e:2x2x1
jax: 0.10.0
libtpu: 0.0.40
codegen_flags: <defaults>
</compile_context>

<pallas_src>
import jax
import jax.numpy as jnp
from jax.experimental import pallas as pl
from jax.experimental.pallas import tpu as pltpu

Z_SIZE = 100
Y_SIZE = 10
K1_PAD = 128          # concat(x, y) width 110 zero-padded to a full lane group
H1 = 128
H2 = 512
OUT = 784             # stored unpadded; 6*128 + 16 -> last vreg group masked vst
MAX_TB = 512          # max batch-tile rows


def _generator_kernel(in_ref, w1_ref, b1_ref, w2_ref, b2_ref, w3_ref, b3_ref,
                      o_ref):
    """One batch tile of the fused 3-layer MLP. Weights are VMEM-resident bf16."""
    # Layer 1: single K=128 dot (x|y concat already fused & padded in wrapper).
    h1 = jnp.dot(in_ref[...], w1_ref[...], preferred_element_type=jnp.float32)
    h1 = jnp.maximum(h1 + b1_ref[...], 0.0).astype(jnp.bfloat16)

    # Layer 2
    h2 = jnp.dot(h1, w2_ref[...], preferred_element_type=jnp.float32)
    h2 = jnp.maximum(h2 + b2_ref[...], 0.0).astype(jnp.bfloat16)

    # Layer 3 (+ Tanh). bf16 tanh -> EUP bf16 path on v6e/v7x, bf16 store.
    h3 = jnp.dot(h2, w3_ref[...], preferred_element_type=jnp.float32)
    o_ref[...] = jnp.tanh((h3 + b3_ref[...]).astype(jnp.bfloat16))


def prepare_params(params):
    """One-time conversion of f32 [in,out] params into kernel layout."""
    w1, b1, w2, b2, w3, b3 = params
    # Zero-pad W1 rows 110 -> 128 so layer 1 is a single lane-aligned K=128 dot.
    w1p = jnp.pad(w1, ((0, K1_PAD - (Z_SIZE + Y_SIZE)), (0, 0))).astype(jnp.bfloat16)
    return (w1p, b1, w2.astype(jnp.bfloat16), b2, w3.astype(jnp.bfloat16), b3)


def _pick_tiling(batch):
    """(tile_rows, n_tiles): minimal batch padding, >=2 tiles for v7x megacore."""
    n_tiles = -(-batch // MAX_TB)            # fewest tiles of <= 512 rows
    if batch >= 16 and n_tiles == 1:
        n_tiles = 2                          # keep both v7x TensorCores busy
    tb = ((-(-batch // n_tiles) + 7) // 8) * 8   # sublane-aligned tile rows
    return tb, n_tiles


def generator_forward(x, y, prepared):
    """x: [B, 100] f32, y: [B, 10] f32 -> [B, 784] bf16 (tanh output)."""
    w1, b1, w2, b2, w3, b3 = prepared
    B = x.shape[0]
    TB, n_tiles = _pick_tiling(B)
    B_pad = n_tiles * TB

    # Fused, lane-aligned bf16 input: concat(x, y) padded 110 -> 128 features,
    # batch padded to a whole number of tiles (pad fuses into XLA producers;
    # inputs are only ~256 B/row so this is cheap vs. the 784-wide output).
    inp = jnp.concatenate([x, y], axis=-1)
    inp = jnp.pad(inp, ((0, B_pad - B), (0, K1_PAD - (Z_SIZE + Y_SIZE))))
    inp = inp.astype(jnp.bfloat16)

    # Constant block index -> weights/biases stay resident in VMEM across tiles.
    const = lambda a: pl.BlockSpec(a.shape, lambda i: (0, 0))

    out = pl.pallas_call(
        _generator_kernel,
        out_shape=jax.ShapeDtypeStruct((B_pad, OUT), jnp.bfloat16),
        grid=(n_tiles,),
        in_specs=[
            pl.BlockSpec((TB, K1_PAD), lambda i: (i, 0)),
            const(w1), const(b1),
            const(w2), const(b2),
            const(w3), const(b3),
        ],
        out_specs=pl.BlockSpec((TB, OUT), lambda i: (i, 0)),
        compiler_params=pltpu.CompilerParams(
            dimension_semantics=("parallel",),   # megacore sharding on v7x
            vmem_limit_bytes=32 << 20),
    )(inp, w1, b1, w2, b2, w3, b3)

    if B_pad != B:
        out = out[:B]        # only when B isn't tileable; rows only, no col slice
    return out


def init_params(key):
    """Xavier-normal weights (like init.xavier_normal_), zero biases.

    Stored as [in, out] (transpose of torch's [out, in]); Xavier std is
    symmetric in fan_in/fan_out so the distribution is identical.
    """
    k1, k2, k3 = jax.random.split(key, 3)

    def xavier(k, fan_in, fan_out):
        std = (2.0 / (fan_in + fan_out)) ** 0.5
        return std * jax.random.normal(k, (fan_in, fan_out), dtype=jnp.float32)

    w1 = xavier(k1, Z_SIZE + Y_SIZE, H1)
    b1 = jnp.zeros((1, H1), dtype=jnp.float32)
    w2 = xavier(k2, H1, H2)
    b2 = jnp.zeros((1, H2), dtype=jnp.float32)
    w3 = xavier(k3, H2, OUT)
    b3 = jnp.zeros((1, OUT), dtype=jnp.float32)
    return (w1, b1, w2, b2, w3, b3)


def reference_forward(x, y, params):
    """Pure-JAX f32 reference for correctness checking."""
    w1, b1, w2, b2, w3, b3 = params
    h = jnp.concatenate([x, y], axis=-1)
    h = jnp.maximum(h @ w1 + b1, 0.0)
    h = jnp.maximum(h @ w2 + b2, 0.0)
    return jnp.tanh(h @ w3 + b3)


if __name__ == "__main__":
    key = jax.random.PRNGKey(0)
    kp, kx, ky = jax.random.split(key, 3)

    params = init_params(kp)
    prepared = prepare_params(params)

    B = 2
    x = jax.random.normal(kx, (B, Z_SIZE), dtype=jnp.float32)      # latent z
    labels = jax.random.randint(ky, (B,), 0, Y_SIZE)               # class labels
    y = jax.nn.one_hot(labels, Y_SIZE, dtype=jnp.float32)

    out = generator_forward(x, y, prepared)
    out = jax.block_until_ready(out)

    ref = reference_forward(x, y, params)
    assert out.shape == (B, OUT), out.shape
    assert out.dtype == jnp.bfloat16, out.dtype
    # bf16 MXU operands / bf16 output store with f32 accumulation -> relaxed
    # tolerance vs f32 reference (tanh outputs are in [-1, 1]).
    out_f32 = out.astype(jnp.float32)
    max_err = float(jnp.max(jnp.abs(out_f32 - ref)))
    assert jnp.allclose(out_f32, ref, atol=5e-2, rtol=0.0), f"max|err|={max_err}"

    print("KERNEL_OK")
</pallas_src>

<mosaic_0001>
module attributes {stable_mosaic.version = 11 : i64} {
  func.func @_generator_kernel(%arg0: i32, %arg1: memref<8x128xbf16, #tpu.memory_space<vmem>>, %arg2: memref<128x128xbf16, #tpu.memory_space<vmem>>, %arg3: memref<1x128xf32, #tpu.memory_space<vmem>>, %arg4: memref<128x512xbf16, #tpu.memory_space<vmem>>, %arg5: memref<1x512xf32, #tpu.memory_space<vmem>>, %arg6: memref<512x784xbf16, #tpu.memory_space<vmem>>, %arg7: memref<1x784xf32, #tpu.memory_space<vmem>>, %arg8: memref<8x784xbf16, #tpu.memory_space<vmem>>) attributes {dimension_semantics = [#tpu.dimension_semantics<parallel>], iteration_bounds = array<i64: 1>, scalar_prefetch = 0 : i64, scratch_operands = 0 : i64, tpu.core_type = #tpu.core_type<tc>, window_params = [{transform_indices = @transform_0, window_bounds = array<i64: 8, 128>}, {pipeline_mode = #tpu.pipeline_mode<synchronous>, transform_indices = @transform_1, window_bounds = array<i64: 128, 128>}, {pipeline_mode = #tpu.pipeline_mode<synchronous>, transform_indices = @transform_2, window_bounds = array<i64: 1, 128>}, {pipeline_mode = #tpu.pipeline_mode<synchronous>, transform_indices = @transform_3, window_bounds = array<i64: 128, 512>}, {pipeline_mode = #tpu.pipeline_mode<synchronous>, transform_indices = @transform_4, window_bounds = array<i64: 1, 512>}, {pipeline_mode = #tpu.pipeline_mode<synchronous>, transform_indices = @transform_5, window_bounds = array<i64: 512, 784>}, {pipeline_mode = #tpu.pipeline_mode<synchronous>, transform_indices = @transform_6, window_bounds = array<i64: 1, 784>}, {transform_indices = @transform_7, window_bounds = array<i64: 8, 784>}]} {
    %c0 = arith.constant 0 : index
    %c0_0 = arith.constant 0 : index
    %0 = vector.load %arg1[%c0, %c0_0] : memref<8x128xbf16, #tpu.memory_space<vmem>>, vector<8x128xbf16>
    %c0_1 = arith.constant 0 : index
    %c0_2 = arith.constant 0 : index
    %1 = vector.load %arg2[%c0_1, %c0_2] : memref<128x128xbf16, #tpu.memory_space<vmem>>, vector<128x128xbf16>
    %cst = arith.constant dense<0.000000e+00> : vector<8x128xf32>
    %2 = tpu.matmul %0, %1, %cst {dimension_numbers = #tpu.dot_dimension_numbers<[1], [0], [0], [1], [0, 0, 1, 1], [], []>} : vector<8x128xbf16>, vector<128x128xbf16>, vector<8x128xf32> -> vector<8x128xf32>
    %c0_3 = arith.constant 0 : index
    %c0_4 = arith.constant 0 : index
    %3 = vector.load %arg3[%c0_3, %c0_4] : memref<1x128xf32, #tpu.memory_space<vmem>>, vector<1x128xf32>
    %4 = vector.broadcast %3 : vector<1x128xf32> to vector<8x128xf32>
    %5 = arith.addf %2, %4 : vector<8x128xf32>
    %cst_5 = arith.constant 0.000000e+00 : f32
    %6 = vector.broadcast %cst_5 : f32 to vector<8x128xf32>
    %7 = arith.maximumf %5, %6 : vector<8x128xf32>
    %8 = arith.truncf %7 : vector<8x128xf32> to vector<8x128xbf16>
    %c0_6 = arith.constant 0 : index
    %c0_7 = arith.constant 0 : index
    %9 = vector.load %arg4[%c0_6, %c0_7] : memref<128x512xbf16, #tpu.memory_space<vmem>>, vector<128x512xbf16>
    %cst_8 = arith.constant dense<0.000000e+00> : vector<8x512xf32>
    %10 = tpu.matmul %8, %9, %cst_8 {dimension_numbers = #tpu.dot_dimension_numbers<[1], [0], [0], [1], [0, 0, 1, 1], [], []>} : vector<8x128xbf16>, vector<128x512xbf16>, vector<8x512xf32> -> vector<8x512xf32>
    %c0_9 = arith.constant 0 : index
    %c0_10 = arith.constant 0 : index
    %11 = vector.load %arg5[%c0_9, %c0_10] : memref<1x512xf32, #tpu.memory_space<vmem>>, vector<1x512xf32>
    %12 = vector.broadcast %11 : vector<1x512xf32> to vector<8x512xf32>
    %13 = arith.addf %10, %12 : vector<8x512xf32>
    %cst_11 = arith.constant 0.000000e+00 : f32
    %14 = vector.broadcast %cst_11 : f32 to vector<8x512xf32>
    %15 = arith.maximumf %13, %14 : vector<8x512xf32>
    %16 = arith.truncf %15 : vector<8x512xf32> to vector<8x512xbf16>
    %c0_12 = arith.constant 0 : index
    %c0_13 = arith.constant 0 : index
    %17 = vector.load %arg6[%c0_12, %c0_13] : memref<512x784xbf16, #tpu.memory_space<vmem>>, vector<512x784xbf16>
    %cst_14 = arith.constant dense<0.000000e+00> : vector<8x784xf32>
    %18 = tpu.matmul %16, %17, %cst_14 {dimension_numbers = #tpu.dot_dimension_numbers<[1], [0], [0], [1], [0, 0, 1, 1], [], []>} : vector<8x512xbf16>, vector<512x784xbf16>, vector<8x784xf32> -> vector<8x784xf32>
    %c0_15 = arith.constant 0 : index
    %c0_16 = arith.constant 0 : index
    %19 = vector.load %arg7[%c0_15, %c0_16] : memref<1x784xf32, #tpu.memory_space<vmem>>, vector<1x784xf32>
    %20 = vector.broadcast %19 : vector<1x784xf32> to vector<8x784xf32>
    %21 = arith.addf %18, %20 : vector<8x784xf32>
    %22 = arith.truncf %21 : vector<8x784xf32> to vector<8x784xbf16>
    %23 = math.tanh %22 : vector<8x784xbf16>
    %c0_17 = arith.constant 0 : index
    %c0_18 = arith.constant 0 : index
    %24 = vector.load %arg8[%c0_17, %c0_18] : memref<8x784xbf16, #tpu.memory_space<vmem>>, vector<8x784xbf16>
    tpu.vector_store %arg8[%c0_17, %c0_18], %23 {strides = array<i32>} : memref<8x784xbf16, #tpu.memory_space<vmem>>, vector<8x784xbf16>,
    return
  }
  func.func @transform_0(%arg0: i32) -> (i32, i32) {
    %c0_i32 = arith.constant 0 : i32
    %c0_i32_0 = arith.constant 0 : i32
    return %arg0, %c0_i32 : i32, i32
  }
  func.func @transform_1(%arg0: i32) -> (i32, i32) {
    %c0_i32 = arith.constant 0 : i32
    %c0_i32_0 = arith.constant 0 : i32
    %c0_i32_1 = arith.constant 0 : i32
    return %c0_i32, %c0_i32_0 : i32, i32
  }
  func.func @transform_2(%arg0: i32) -> (i32, i32) {
    %c0_i32 = arith.constant 0 : i32
    %c0_i32_0 = arith.constant 0 : i32
    %c0_i32_1 = arith.constant 0 : i32
    return %c0_i32, %c0_i32_0 : i32, i32
  }
  func.func @transform_3(%arg0: i32) -> (i32, i32) {
    %c0_i32 = arith.constant 0 : i32
    %c0_i32_0 = arith.constant 0 : i32
    %c0_i32_1 = arith.constant 0 : i32
    return %c0_i32, %c0_i32_0 : i32, i32
  }
  func.func @transform_4(%arg0: i32) -> (i32, i32) {
    %c0_i32 = arith.constant 0 : i32
    %c0_i32_0 = arith.constant 0 : i32
    %c0_i32_1 = arith.constant 0 : i32
    return %c0_i32, %c0_i32_0 : i32, i32
  }
  func.func @transform_5(%arg0: i32) -> (i32, i32) {
    %c0_i32 = arith.constant 0 : i32
    %c0_i32_0 = arith.constant 0 : i32
    %c0_i32_1 = arith.constant 0 : i32
    return %c0_i32, %c0_i32_0 : i32, i32
  }
  func.func @transform_6(%arg0: i32) -> (i32, i32) {
    %c0_i32 = arith.constant 0 : i32
    %c0_i32_0 = arith.constant 0 : i32
    %c0_i32_1 = arith.constant 0 : i32
    return %c0_i32, %c0_i32_0 : i32, i32
  }
  func.func @transform_7(%arg0: i32) -> (i32, i32) {
    %c0_i32 = arith.constant 0 : i32
    %c0_i32_0 = arith.constant 0 : i32
    return %arg0, %c0_i32 : i32, i32
  }
}

</mosaic_0001>

<bundles_post_ra>
// kernel: tpu_custom_call.1
= control target key start
LH: loop header
LB: loop body
LE: loop exit
PB: predicated region body
PF: predicated region fallthrough
CT: control target
= control target key end

     0   :  { %v3030_v1 = vmov 0.0   ;;  %vm3031_vm0 = vmmov 0   ;;  %v3032_v42 = vmov 0   ;;  %s3939_s0 = inlined_call_operand.vmem [shape: bf16[8,128], index: 0, kind: input, shape index: {}]   ;;  %s3940_s1 = inlined_call_operand.vmem [shape: bf16[128,128], index: 1, kind: input, shape index: {}]   ;;  %s3941_s2 = inlined_call_operand.vmem [shape: f32[1,128], index: 2, kind: input, shape index: {}]   ;;  %s3942_s3 = inlined_call_operand.vmem [shape: bf16[128,512], index: 3, kind: input, shape index: {}]   ;;  %s3943_s4 = inlined_call_operand.vmem [shape: f32[1,512], index: 4, kind: input, shape index: {}]   ;;  %s3944_s5 = inlined_call_operand.vmem [shape: bf16[512,784], index: 5, kind: input, shape index: {}]   ;;  %s3945_s6 = inlined_call_operand.vmem [shape: f32[1,784], index: 6, kind: input, shape index: {}]   ;;  %s3946_s7 = inlined_call_operand.hbm [shape: bf16[8,784], index: 7, kind: output, shape index: {}]  }
   0x1   :  { %v2618_v0 = vld [vmem:[%s3940_s1 + $0x38] sm:$0xff]   ;;  %2594 = vmatprep.subr.bf16.mxu0 %v3030_v1  ;;  %v2619_v2 = vld [vmem:[%s3940_s1 + $0x30] sm:$0xff]   ;;  %2610 = vmatprep.mubr.msk.bf16.mxu0 %vm3031_vm0, %v3030_v1  ;;  %v2620_v3 = vld [vmem:[%s3940_s1 + $0x28] sm:$0xff]  }
   0x2   :  { %2595 = vmatpush3.bf16.msra.mxu0 %v2618_v0  ;;  %v2626_v4 = vld [vmem:[%s3942_s3 + $0xe4] ss:$16 sps:$4 sm:$0xff]   ;;  %v2631_v6 = vld [vmem:[%s3942_s3 + $0xe0] ss:$16 sps:$4 sm:$0xff]   ;;  %v2622_v8 = vld [vmem:[%s3940_s1 + $0x18] sm:$0xff]   ;;  %388 = vmatprep.mubr.bf16.mxu1 %v3032_v42 }
   0x3   :  { %2596 = vmatprep.subr.bf16.mxu0 %v3030_v1  ;;  %v2621_v5 = vld [vmem:[%s3940_s1 + $0x20] sm:$0xff]   ;;  %356 = vmatprep.subr.bf16.mxu1 %v2626_v4  ;;  %v2623_v13 = vld [vmem:[%s3940_s1 + $0x10] sm:$0xff]   ;;  %v2624_v16 = vld [vmem:[%s3940_s1 + $0x8] sm:$0xff]  }
   0x4   :  { %v2632_v7 = vld [vmem:[%s3942_s3 + $0xc4] ss:$16 sps:$4 sm:$0xff]   ;;  %357 = vmatpush1.bf16.msra.mxu1 %v2631_v6  ;;  %v2637_v9 = vld [vmem:[%s3942_s3 + $0xc0] ss:$16 sps:$4 sm:$0xff]   ;;  %v2630_v20 = vld [vmem:[%s3942_s3 + $0xec] ss:$16 sps:$4 sm:$0xff]  }
   0x5   :  { %358 = vmatprep.subr.bf16.mxu1 %v2632_v7  ;;  %v2638_v10 = vld [vmem:[%s3942_s3 + $0xa4] ss:$16 sps:$4 sm:$0xff]   ;;  %v2643_v11 = vld [vmem:[%s3942_s3 + $0xa0] ss:$16 sps:$4 sm:$0xff]   ;;  %v2628_v24 = vld [vmem:[%s3942_s3 + $0xe8] ss:$16 sps:$4 sm:$0xff]  }
   0x6   :  { %2597 = vmatpush3.bf16.msra.mxu0 %v2619_v2  ;;  %v2644_v12 = vld [vmem:[%s3942_s3 + $0x84] ss:$16 sps:$4 sm:$0xff]   ;;  %v2649_v14 = vld [vmem:[%s3942_s3 + $0x80] ss:$16 sps:$4 sm:$0xff]   ;;  %v2636_v25 = vld [vmem:[%s3942_s3 + $0xcc] ss:$16 sps:$4 sm:$0xff]  }
   0x7   :  { %2598 = vmatprep.subr.bf16.mxu0 %v3030_v1  ;;  %v2650_v15 = vld [vmem:[%s3942_s3 + $0x64] ss:$16 sps:$4 sm:$0xff]   ;;  %v2655_v17 = vld [vmem:[%s3942_s3 + $0x60] ss:$16 sps:$4 sm:$0xff]   ;;  %v2634_v26 = vld [vmem:[%s3942_s3 + $0xc8] ss:$16 sps:$4 sm:$0xff]  }
   0x8   :  { %359 = vmatpush1.bf16.msra.mxu1 %v2637_v9  ;;  %v2656_v18 = vld [vmem:[%s3942_s3 + $0x44] ss:$16 sps:$4 sm:$0xff]   ;;  %v2661_v21 = vld [vmem:[%s3942_s3 + $0x40] ss:$16 sps:$4 sm:$0xff]   ;;  %v2642_v27 = vld [vmem:[%s3942_s3 + $0xac] ss:$16 sps:$4 sm:$0xff]  }
   0x9   :  { %360 = vmatprep.subr.bf16.mxu1 %v2638_v10  ;;  %v2625_v19 = vld [vmem:[%s3940_s1] sm:$0xff]   ;;  %v2640_v28 = vld [vmem:[%s3942_s3 + $0xa8] ss:$16 sps:$4 sm:$0xff]   ;;  %v2648_v29 = vld [vmem:[%s3942_s3 + $0x8c] ss:$16 sps:$4 sm:$0xff]  }
   0xa   :  { %2599 = vmatpush3.bf16.msra.mxu0 %v2620_v3  ;;  %v2662_v22 = vld [vmem:[%s3942_s3 + $0x24] ss:$16 sps:$4 sm:$0xff]   ;;  %v28_v23 = vld [vmem:[%s3939_s0] sm:$0xf]  ;;  %v2646_v30 = vld [vmem:[%s3942_s3 + $0x88] ss:$16 sps:$4 sm:$0xff]  }
   0xb   :  { %2600 = vmatprep.subr.bf16.mxu0 %v3030_v1  ;;  %v2654_v31 = vld [vmem:[%s3942_s3 + $0x6c] ss:$16 sps:$4 sm:$0xff]   ;;  %v2652_v32 = vld [vmem:[%s3942_s3 + $0x68] ss:$16 sps:$4 sm:$0xff]   ;;  %v2667_v37 = vld [vmem:[%s3942_s3 + $0x20] ss:$16 sps:$4 sm:$0xff]  }
   0xc   :  { %361 = vmatpush1.bf16.msra.mxu1 %v2643_v11  ;;  %v2660_v33 = vld [vmem:[%s3942_s3 + $0x4c] ss:$16 sps:$4 sm:$0xff]   ;;  %v2658_v34 = vld [vmem:[%s3942_s3 + $0x48] ss:$16 sps:$4 sm:$0xff]   ;;  %v2668_v38 = vld [vmem:[%s3942_s3 + $0x4] ss:$16 sps:$4 sm:$0xff]  }
   0xd   :  { %362 = vmatprep.subr.bf16.mxu1 %v2644_v12  ;;  %v2666_v35 = vld [vmem:[%s3942_s3 + $0x2c] ss:$16 sps:$4 sm:$0xff]   ;;  %v2664_v36 = vld [vmem:[%s3942_s3 + $0x28] ss:$16 sps:$4 sm:$0xff]   ;;  %v2673_v41 = vld [vmem:[%s3942_s3] ss:$16 sps:$4 sm:$0xff]  }
   0xe   :  { %2601 = vmatpush3.bf16.msra.mxu0 %v2621_v5  ;;  %v2672_v39 = vld [vmem:[%s3942_s3 + $0xc] ss:$16 sps:$4 sm:$0xff]   ;;  %v2670_v40 = vld [vmem:[%s3942_s3 + $0x8] ss:$16 sps:$4 sm:$0xff]  }
   0xf   :  { %2602 = vmatprep.subr.bf16.mxu0 %v3030_v1  ;;  %v2676_v43 = vld [vmem:[%s3944_s5 + $0x18c] ss:$28 sps:$4 sm:$0xff]  }
  0x10   :  { %363 = vmatpush1.bf16.msra.mxu1 %v2649_v14  ;;  %v2679_v44 = vld [vmem:[%s3944_s5 + $0x50c] ss:$28 sps:$4 sm:$0xff]  }
  0x11   :  { %364 = vmatprep.subr.bf16.mxu1 %v2650_v15 }
  0x12   :  { %2603 = vmatpush3.bf16.msra.mxu0 %v2622_v8 }
  0x13   :  { %2604 = vmatprep.subr.bf16.mxu0 %v3030_v1 }
  0x14   :  { %365 = vmatpush1.bf16.msra.mxu1 %v2655_v17 }
  0x15   :  { %366 = vmatprep.subr.bf16.mxu1 %v2656_v18 }
  0x16   :  { %2605 = vmatpush3.bf16.msra.mxu0 %v2623_v13 }
  0x17   :  { %2606 = vmatprep.subr.bf16.mxu0 %v3030_v1 }
  0x18   :  { %367 = vmatpush1.bf16.msra.mxu1 %v2661_v21 }
  0x19   :  { %368 = vmatprep.subr.bf16.mxu1 %v2662_v22 }
  0x1a   :  { %2607 = vmatpush3.bf16.msra.mxu0 %v2624_v16 }
  0x1b   :  { %2608 = vmatprep.subr.bf16.mxu0 %v3030_v1 }
  0x1c   :  { %369 = vmatpush1.bf16.msra.mxu1 %v2667_v37 }
  0x1d   :  { %370 = vmatprep.subr.bf16.mxu1 %v2668_v38 }
  0x1e   :  { %2609 = vmatpush3.bf16.msra.mxu0 %v2625_v19 }
  0x1f   :  { %397 = vmatprep.subr.bf16.mxu0 %v2630_v20 }
  0x20   :  { %371 = vmatpush1.bf16.msra.mxu1 %v2673_v41 }
  0x21   :  { %2611 = vmatmul.mubr.bf16.vlgmr.msra.gmra.mxu0 %v28_v23  ;;  %1891 = vmatprep.subr.bf16.mxu1 %v2676_v43 }
  0x22   :  { %398 = vmatpush1.bf16.msra.mxu0 %v2628_v24  ;;  %429 = vmatprep.mubr.bf16.mxu0 %v3032_v42 }
  0x23   :  { %399 = vmatprep.subr.bf16.mxu0 %v2636_v25 }
  0x26   :  { %400 = vmatpush1.bf16.msra.mxu0 %v2634_v26 }
  0x27   :  { %401 = vmatprep.subr.bf16.mxu0 %v2642_v27 }
  0x2a   :  { %402 = vmatpush1.bf16.msra.mxu0 %v2640_v28 }
  0x2b   :  { %403 = vmatprep.subr.bf16.mxu0 %v2648_v29 }
  0x2e   :  { %404 = vmatpush1.bf16.msra.mxu0 %v2646_v30 }
  0x2f   :  { %405 = vmatprep.subr.bf16.mxu0 %v2654_v31 }
  0x32   :  { %406 = vmatpush1.bf16.msra.mxu0 %v2652_v32 }
  0x33   :  { %407 = vmatprep.subr.bf16.mxu0 %v2660_v33 }
  0x36   :  { %408 = vmatpush1.bf16.msra.mxu0 %v2658_v34 }
  0x37   :  { %409 = vmatprep.subr.bf16.mxu0 %v2666_v35 }
  0x3a   :  { %410 = vmatpush1.bf16.msra.mxu0 %v2664_v36 }
  0x3b   :  { %411 = vmatprep.subr.bf16.mxu0 %v2672_v39 }
  0x3e   :  { %412 = vmatpush1.bf16.msra.mxu0 %v2670_v40 }
  0x3f   :  { %1932 = vmatprep.subr.bf16.mxu0 %v2679_v44 }
  0x40   :  { %12 = vsyncpa [#allocation3], 0  ;;  %v2272_v45 = vld [vmem:[%s3941_s2] ss:$0 sm:$0xff]  ;;  %v2674_v51 = vld [vmem:[%s3944_s5 + $0x188] ss:$28 sps:$4 sm:$0xff]  }
  0x41   :  { %v2677_v52 = vld [vmem:[%s3944_s5 + $0x508] ss:$28 sps:$4 sm:$0xff]   ;;  %v2682_v54 = vld [vmem:[%s3944_s5 + $0x154] ss:$28 sps:$4 sm:$0xff]   ;;  %v2688_v59 = vld [vmem:[%s3944_s5 + $0x11c] ss:$28 sps:$4 sm:$0xff]  }
  0x42   :  { %v2685_v55 = vld [vmem:[%s3944_s5 + $0x4d4] ss:$28 sps:$4 sm:$0xff]   ;;  %v2691_v60 = vld [vmem:[%s3944_s5 + $0x49c] ss:$28 sps:$4 sm:$0xff]   ;;  %v2694_v63 = vld [vmem:[%s3944_s5 + $0xe4] ss:$28 sps:$4 sm:$0xff]  }
  0x43   :  { %v2680_v57 = vld [vmem:[%s3944_s5 + $0x150] ss:$28 sps:$4 sm:$0xff]   ;;  %v2686_v61 = vld [vmem:[%s3944_s5 + $0x118] ss:$28 sps:$4 sm:$0xff]   ;;  %v2697_v0 = vld [vmem:[%s3944_s5 + $0x464] ss:$28 sps:$4 sm:$0xff]  }
  0x44   :  { %v2683_v58 = vld [vmem:[%s3944_s5 + $0x4d0] ss:$28 sps:$4 sm:$0xff]   ;;  %v2689_v62 = vld [vmem:[%s3944_s5 + $0x498] ss:$28 sps:$4 sm:$0xff]   ;;  %v2692_v1 = vld [vmem:[%s3944_s5 + $0xe0] ss:$28 sps:$4 sm:$0xff]  }
  0x45   :  { %v2695_v2 = vld [vmem:[%s3944_s5 + $0x460] ss:$28 sps:$4 sm:$0xff]   ;;  %v2700_v3 = vld [vmem:[%s3944_s5 + $0xac] ss:$28 sps:$4 sm:$0xff]   ;;  %v2706_v7 = vld [vmem:[%s3944_s5 + $0x74] ss:$28 sps:$4 sm:$0xff]  }
  0x46   :  { %v2703_v4 = vld [vmem:[%s3944_s5 + $0x42c] ss:$28 sps:$4 sm:$0xff]   ;;  %v2709_v8 = vld [vmem:[%s3944_s5 + $0x3f4] ss:$28 sps:$4 sm:$0xff]   ;;  %v2712_v11 = vld [vmem:[%s3944_s5 + $0x3c] ss:$28 sps:$4 sm:$0xff]  }
  0x47   :  { %v2698_v5 = vld [vmem:[%s3944_s5 + $0xa8] ss:$28 sps:$4 sm:$0xff]   ;;  %v2704_v9 = vld [vmem:[%s3944_s5 + $0x70] ss:$28 sps:$4 sm:$0xff]   ;;  %v2715_v12 = vld [vmem:[%s3944_s5 + $0x3bc] ss:$28 sps:$4 sm:$0xff]  }
  0x48   :  { %v2701_v6 = vld [vmem:[%s3944_s5 + $0x428] ss:$28 sps:$4 sm:$0xff]   ;;  %v2707_v10 = vld [vmem:[%s3944_s5 + $0x3f0] ss:$28 sps:$4 sm:$0xff]   ;;  %v2710_v13 = vld [vmem:[%s3944_s5 + $0x38] ss:$28 sps:$4 sm:$0xff]  }
  0x49   :  { %v2713_v14 = vld [vmem:[%s3944_s5 + $0x3b8] ss:$28 sps:$4 sm:$0xff]   ;;  %v2718_v15 = vld [vmem:[%s3944_s5 + $0x4] ss:$28 sps:$4 sm:$0xff]   ;;  %v2724_v19 = vld [vmem:[%s3944_s5 + $0x34c] ss:$28 sps:$4 sm:$0xff]  }
  0x4a   :  { %v2721_v16 = vld [vmem:[%s3944_s5 + $0x384] ss:$28 sps:$4 sm:$0xff]   ;;  %v2727_v20 = vld [vmem:[%s3944_s5 + $0x6cc] ss:$28 sps:$4 sm:$0xff]   ;;  %v2730_v23 = vld [vmem:[%s3944_s5 + $0x314] ss:$28 sps:$4 sm:$0xff]  }
  0x4b   :  { %v2716_v17 = vld [vmem:[%s3944_s5] ss:$28 sps:$4 sm:$0xff]   ;;  %v2722_v21 = vld [vmem:[%s3944_s5 + $0x348] ss:$28 sps:$4 sm:$0xff]   ;;  %v2733_v24 = vld [vmem:[%s3944_s5 + $0x694] ss:$28 sps:$4 sm:$0xff]  }
  0x4c   :  { %v2719_v18 = vld [vmem:[%s3944_s5 + $0x380] ss:$28 sps:$4 sm:$0xff]   ;;  %v2725_v22 = vld [vmem:[%s3944_s5 + $0x6c8] ss:$28 sps:$4 sm:$0xff]   ;;  %v2728_v25 = vld [vmem:[%s3944_s5 + $0x310] ss:$28 sps:$4 sm:$0xff]  }
  0x4d   :  { %v2731_v26 = vld [vmem:[%s3944_s5 + $0x690] ss:$28 sps:$4 sm:$0xff]   ;;  %v2736_v27 = vld [vmem:[%s3944_s5 + $0x2dc] ss:$28 sps:$4 sm:$0xff]   ;;  %v2742_v31 = vld [vmem:[%s3944_s5 + $0x2a4] ss:$28 sps:$4 sm:$0xff]  }
  0x4e   :  { %v2739_v28 = vld [vmem:[%s3944_s5 + $0x65c] ss:$28 sps:$4 sm:$0xff]   ;;  %v2745_v32 = vld [vmem:[%s3944_s5 + $0x624] ss:$28 sps:$4 sm:$0xff]   ;;  %v2748_v35 = vld [vmem:[%s3944_s5 + $0x26c] ss:$28 sps:$4 sm:$0xff]  }
  0x4f   :  { %v2734_v29 = vld [vmem:[%s3944_s5 + $0x2d8] ss:$28 sps:$4 sm:$0xff]   ;;  %v2740_v33 = vld [vmem:[%s3944_s5 + $0x2a0] ss:$28 sps:$4 sm:$0xff]   ;;  %v2751_v36 = vld [vmem:[%s3944_s5 + $0x5ec] ss:$28 sps:$4 sm:$0xff]  }
  0x50   :  { %v2737_v30 = vld [vmem:[%s3944_s5 + $0x658] ss:$28 sps:$4 sm:$0xff]   ;;  %v2743_v34 = vld [vmem:[%s3944_s5 + $0x620] ss:$28 sps:$4 sm:$0xff]   ;;  %v2746_v37 = vld [vmem:[%s3944_s5 + $0x268] ss:$28 sps:$4 sm:$0xff]  }
  0x51   :  { %v2749_v38 = vld [vmem:[%s3944_s5 + $0x5e8] ss:$28 sps:$4 sm:$0xff]   ;;  %v2754_v39 = vld [vmem:[%s3944_s5 + $0x234] ss:$28 sps:$4 sm:$0xff]   ;;  %v2760_v43 = vld [vmem:[%s3944_s5 + $0x1fc] ss:$28 sps:$4 sm:$0xff]  }
  0x52   :  { %v2757_v40 = vld [vmem:[%s3944_s5 + $0x5b4] ss:$28 sps:$4 sm:$0xff]   ;;  %v2763_v44 = vld [vmem:[%s3944_s5 + $0x57c] ss:$28 sps:$4 sm:$0xff]   ;;  %vm2256_vm1 = vcmask 125952  }
  0x53   :  { %v2752_v41 = vld [vmem:[%s3944_s5 + $0x230] ss:$28 sps:$4 sm:$0xff]  }
  0x54   :  { %v2755_v42 = vld [vmem:[%s3944_s5 + $0x5b0] ss:$28 sps:$4 sm:$0xff]  }
  0xe1   :  { %v134_v46 = vpop.f32.mrf.mxu0 }
  0xe2   :  { %v135_v47 = vadd.f32 %v2272_v45, %v134_v46  ;;  %v2758_v45 = vld [vmem:[%s3944_s5 + $0x1f8] ss:$28 sps:$4 sm:$0xff]  }
  0xe3   :  { %v2612_v48 = vpop.f32.mrf.mxu0  ;;  %v2761_v46 = vld [vmem:[%s3944_s5 + $0x578] ss:$28 sps:$4 sm:$0xff]  }
  0xe4   :  { %v140_v49 = vmax.f32 %v135_v47, 0.0  ;;  %v2766_v47 = vld [vmem:[%s3944_s5 + $0x1c4] ss:$28 sps:$4 sm:$0xff]  }
  0xe5   :  { %v137_v50 = vpop.f32.mrf.mxu0  ;;  %v2769_v48 = vld [vmem:[%s3944_s5 + $0x544] ss:$28 sps:$4 sm:$0xff]  }
  0xe6   :  { %v141_v53 = vpack.c.bf16 %v140_v49, %v140_v49  ;;  %v2764_v49 = vld [vmem:[%s3944_s5 + $0x1c0] ss:$28 sps:$4 sm:$0xff]  }
  0xe7   :  { %v2613_v56 = vpop.f32.mrf.mxu0  ;;  %v2767_v50 = vld [vmem:[%s3944_s5 + $0x540] ss:$28 sps:$4 sm:$0xff]  }
  0xe8   :  { %389 = vmatmul.mubr.bf16.vlgmr.msra.gmra.mxu1 %v141_v53  ;;  %430 = vmatmul.mubr.bf16.vlgmr.msra.gmra.mxu0 %v141_v53  ;;  %v176_v53 = vlaneseq }
  0xe9   :  { %1892 = vmatpush1.bf16.msra.mxu1 %v2674_v51  ;;  %1933 = vmatpush1.bf16.msra.mxu0 %v2677_v52  ;;  %v2772_v51 = vld [vmem:[%s3944_s5 + $0x194] ss:$28 sps:$4 sm:$0xff]  }
  0xea   :  { %1893 = vmatprep.subr.bf16.mxu1 %v2682_v54  ;;  %1934 = vmatprep.subr.bf16.mxu0 %v2685_v55  ;;  %v2775_v52 = vld [vmem:[%s3944_s5 + $0x514] ss:$28 sps:$4 sm:$0xff]   ;;  %v3398_v54 = vshrl.u32 %v176_v53, 7 }
  0xeb   :  { %v2821_v53 = vld [vmem:[%s3944_s5 + $0x6d0] ss:$28 sps:$4 sm:$0xff]  }
  0xec   :  { %v178_v55 = vsub.s32 0, %v3398_v54  ;;  %v186_v56 = vsub.s32 2, %v3398_v54 }
  0xed   :  { %1894 = vmatpush1.bf16.msra.mxu1 %v2680_v57  ;;  %1935 = vmatpush1.bf16.msra.mxu0 %v2683_v58  ;;  %v174_v57 = vld [vmem:[%s3943_s4] sm:$0xf]  ;;  %v182_v58 = vsub.s32 1, %v3398_v54 }
  0xee   :  { %1895 = vmatprep.subr.bf16.mxu1 %v2688_v59  ;;  %1936 = vmatprep.subr.bf16.mxu0 %v2691_v60  ;;  %v190_v59 = vsub.s32 3, %v3398_v54  ;;  %v179_v60 = vrot.slane %v174_v57, %v178_v55 }
  0xf1   :  { %1896 = vmatpush1.bf16.msra.mxu1 %v2686_v61  ;;  %1937 = vmatpush1.bf16.msra.mxu0 %v2689_v62  ;;  %v187_v61 = vrot.slane %v174_v57, %v186_v56  ;;  %v183_v62 = vrot.slane %v174_v57, %v182_v58 }
  0xf2   :  { %1897 = vmatprep.subr.bf16.mxu1 %v2694_v63  ;;  %1938 = vmatprep.subr.bf16.mxu0 %v2697_v0  ;;  %v191_v63 = vrot.slane %v174_v57, %v190_v59  ;;  %v2826_v57 = vld [vmem:[%s3944_s5 + $0x31c] ss:$28 sps:$4 sm:$0xff]  }
  0xf5   :  { %1898 = vmatpush1.bf16.msra.mxu1 %v2692_v1  ;;  %1939 = vmatpush1.bf16.msra.mxu0 %v2695_v2 }
  0xf6   :  { %1899 = vmatprep.subr.bf16.mxu1 %v2700_v3  ;;  %1940 = vmatprep.subr.bf16.mxu0 %v2703_v4 }
  0xf9   :  { %1900 = vmatpush1.bf16.msra.mxu1 %v2698_v5  ;;  %1941 = vmatpush1.bf16.msra.mxu0 %v2701_v6 }
  0xfa   :  { %1901 = vmatprep.subr.bf16.mxu1 %v2706_v7  ;;  %1942 = vmatprep.subr.bf16.mxu0 %v2709_v8 }
  0xfd   :  { %1902 = vmatpush1.bf16.msra.mxu1 %v2704_v9  ;;  %1943 = vmatpush1.bf16.msra.mxu0 %v2707_v10 }
  0xfe   :  { %1903 = vmatprep.subr.bf16.mxu1 %v2712_v11  ;;  %1944 = vmatprep.subr.bf16.mxu0 %v2715_v12 }
 0x101   :  { %1904 = vmatpush1.bf16.msra.mxu1 %v2710_v13  ;;  %1945 = vmatpush1.bf16.msra.mxu0 %v2713_v14 }
 0x102   :  { %1905 = vmatprep.subr.bf16.mxu1 %v2718_v15  ;;  %1946 = vmatprep.subr.bf16.mxu0 %v2721_v16 }
 0x105   :  { %1906 = vmatpush1.bf16.msra.mxu1 %v2716_v17  ;;  %1947 = vmatpush1.bf16.msra.mxu0 %v2719_v18  ;;  %v2770_v18 = vld [vmem:[%s3944_s5 + $0x190] ss:$28 sps:$4 sm:$0xff]  }
 0x106   :  { %1907 = vmatprep.subr.bf16.mxu1 %v2724_v19  ;;  %1948 = vmatprep.subr.bf16.mxu0 %v2727_v20  ;;  %v2773_v19 = vld [vmem:[%s3944_s5 + $0x510] ss:$28 sps:$4 sm:$0xff]  }
 0x109   :  { %1908 = vmatpush2.bf16.msra.mxu1 %v2722_v21  ;;  %1949 = vmatpush2.bf16.msra.mxu0 %v2725_v22  ;;  %v2778_v22 = vld [vmem:[%s3944_s5 + $0x15c] ss:$28 sps:$4 sm:$0xff]  }
 0x10a   :  { %1909 = vmatprep.subr.bf16.mxu1 %v2730_v23  ;;  %1950 = vmatprep.subr.bf16.mxu0 %v2733_v24  ;;  %v2781_v23 = vld [vmem:[%s3944_s5 + $0x4dc] ss:$28 sps:$4 sm:$0xff]  }
 0x10b   :  { %v2776_v24 = vld [vmem:[%s3944_s5 + $0x158] ss:$28 sps:$4 sm:$0xff]  }
 0x10d   :  { %1910 = vmatpush2.bf16.msra.mxu1 %v2728_v25  ;;  %1951 = vmatpush2.bf16.msra.mxu0 %v2731_v26  ;;  %v2779_v25 = vld [vmem:[%s3944_s5 + $0x4d8] ss:$28 sps:$4 sm:$0xff]   ;;  %v2784_v26 = vld [vmem:[%s3944_s5 + $0x124] ss:$28 sps:$4 sm:$0xff]  }
 0x10e   :  { %1911 = vmatprep.subr.bf16.mxu1 %v2736_v27  ;;  %1952 = vmatprep.subr.bf16.mxu0 %v2739_v28  ;;  %v2787_v27 = vld [vmem:[%s3944_s5 + $0x4a4] ss:$28 sps:$4 sm:$0xff]  }
 0x10f   :  { %v2782_v28 = vld [vmem:[%s3944_s5 + $0x120] ss:$28 sps:$4 sm:$0xff]  }
 0x111   :  { %1912 = vmatpush2.bf16.msra.mxu1 %v2734_v29  ;;  %1953 = vmatpush2.bf16.msra.mxu0 %v2737_v30  ;;  %v2785_v29 = vld [vmem:[%s3944_s5 + $0x4a0] ss:$28 sps:$4 sm:$0xff]   ;;  %v2790_v30 = vld [vmem:[%s3944_s5 + $0xec] ss:$28 sps:$4 sm:$0xff]  }
 0x112   :  { %1913 = vmatprep.subr.bf16.mxu1 %v2742_v31  ;;  %1954 = vmatprep.subr.bf16.mxu0 %v2745_v32  ;;  %v2793_v31 = vld [vmem:[%s3944_s5 + $0x46c] ss:$28 sps:$4 sm:$0xff]  }
 0x113   :  { %v2788_v32 = vld [vmem:[%s3944_s5 + $0xe8] ss:$28 sps:$4 sm:$0xff]  }
 0x115   :  { %1914 = vmatpush2.bf16.msra.mxu1 %v2740_v33  ;;  %1955 = vmatpush2.bf16.msra.mxu0 %v2743_v34  ;;  %v2791_v33 = vld [vmem:[%s3944_s5 + $0x468] ss:$28 sps:$4 sm:$0xff]   ;;  %v2796_v34 = vld [vmem:[%s3944_s5 + $0xb4] ss:$28 sps:$4 sm:$0xff]  }
 0x116   :  { %1915 = vmatprep.subr.bf16.mxu1 %v2748_v35  ;;  %1956 = vmatprep.subr.bf16.mxu0 %v2751_v36  ;;  %v2799_v35 = vld [vmem:[%s3944_s5 + $0x434] ss:$28 sps:$4 sm:$0xff]  }
 0x117   :  { %v2794_v36 = vld [vmem:[%s3944_s5 + $0xb0] ss:$28 sps:$4 sm:$0xff]  }
 0x119   :  { %1916 = vmatpush2.bf16.msra.mxu1 %v2746_v37  ;;  %1957 = vmatpush2.bf16.msra.mxu0 %v2749_v38  ;;  %v2797_v37 = vld [vmem:[%s3944_s5 + $0x430] ss:$28 sps:$4 sm:$0xff]   ;;  %v2802_v38 = vld [vmem:[%s3944_s5 + $0x7c] ss:$28 sps:$4 sm:$0xff]  }
 0x11a   :  { %1917 = vmatprep.subr.bf16.mxu1 %v2754_v39  ;;  %1958 = vmatprep.subr.bf16.mxu0 %v2757_v40  ;;  %v2805_v39 = vld [vmem:[%s3944_s5 + $0x3fc] ss:$28 sps:$4 sm:$0xff]  }
 0x11b   :  { %v2800_v40 = vld [vmem:[%s3944_s5 + $0x78] ss:$28 sps:$4 sm:$0xff]  }
 0x11d   :  { %1918 = vmatpush2.bf16.msra.mxu1 %v2752_v41  ;;  %1959 = vmatpush2.bf16.msra.mxu0 %v2755_v42  ;;  %v2803_v41 = vld [vmem:[%s3944_s5 + $0x3f8] ss:$28 sps:$4 sm:$0xff]   ;;  %v2808_v42 = vld [vmem:[%s3944_s5 + $0x44] ss:$28 sps:$4 sm:$0xff]  }
 0x11e   :  { %1919 = vmatprep.subr.bf16.mxu1 %v2760_v43  ;;  %1960 = vmatprep.subr.bf16.mxu0 %v2763_v44  ;;  %v2811_v43 = vld [vmem:[%s3944_s5 + $0x3c4] ss:$28 sps:$4 sm:$0xff]  }
 0x11f   :  { %v2806_v44 = vld [vmem:[%s3944_s5 + $0x40] ss:$28 sps:$4 sm:$0xff]  }
 0x121   :  { %1920 = vmatpush2.bf16.msra.mxu1 %v2758_v45  ;;  %1961 = vmatpush2.bf16.msra.mxu0 %v2761_v46  ;;  %v2809_v45 = vld [vmem:[%s3944_s5 + $0x3c0] ss:$28 sps:$4 sm:$0xff]   ;;  %v2814_v46 = vld [vmem:[%s3944_s5 + $0xc] ss:$28 sps:$4 sm:$0xff]  }
 0x122   :  { %1921 = vmatprep.subr.bf16.mxu1 %v2766_v47  ;;  %1962 = vmatprep.subr.bf16.mxu0 %v2769_v48  ;;  %v2817_v47 = vld [vmem:[%s3944_s5 + $0x38c] ss:$28 sps:$4 sm:$0xff]  }
 0x123   :  { %v2812_v48 = vld [vmem:[%s3944_s5 + $0x8] ss:$28 sps:$4 sm:$0xff]  }
 0x125   :  { %1922 = vmatpush2.bf16.msra.mxu1 %v2764_v49  ;;  %1963 = vmatpush2.bf16.msra.mxu0 %v2767_v50  ;;  %v2815_v49 = vld [vmem:[%s3944_s5 + $0x388] ss:$28 sps:$4 sm:$0xff]   ;;  %v2820_v50 = vld [vmem:[%s3944_s5 + $0x354] ss:$28 sps:$4 sm:$0xff]  }
 0x126   :  { %1973 = vmatprep.subr.bf16.mxu1 %v2772_v51  ;;  %2014 = vmatprep.subr.bf16.mxu0 %v2775_v52  ;;  %v2823_v51 = vld [vmem:[%s3944_s5 + $0x6d4] ss:$28 sps:$4 sm:$0xff]  }
 0x127   :  { %v2818_v52 = vld [vmem:[%s3944_s5 + $0x350] ss:$28 sps:$4 sm:$0xff]  }
 0x1a8   :  { %v390_v0 = vpop.f32.mrf.mxu1  ;;  %v431_v1 = vpop.f32.mrf.mxu0 }
 0x1a9   :  { %v391_v2 = vadd.f32 %v390_v0, %v179_v60  ;;  %v432_v3 = vadd.f32 %v431_v1, %v187_v61  ;;  %v2829_v60 = vld [vmem:[%s3944_s5 + $0x69c] ss:$28 sps:$4 sm:$0xff]   ;;  %v2835_v0 = vld [vmem:[%s3944_s5 + $0x664] ss:$28 sps:$4 sm:$0xff]  }
 0x1aa   :  { %v392_v4 = vpop.f32.mrf.mxu1  ;;  %v433_v5 = vpop.f32.mrf.mxu0  ;;  %v2824_v61 = vld [vmem:[%s3944_s5 + $0x318] ss:$28 sps:$4 sm:$0xff]   ;;  %v2830_v1 = vld [vmem:[%s3944_s5 + $0x2e0] ss:$28 sps:$4 sm:$0xff]  }
 0x1ab   :  { %v393_v6 = vadd.f32 %v392_v4, %v183_v62  ;;  %v434_v7 = vadd.f32 %v433_v5, %v191_v63  ;;  %v438_v8 = vmax.f32 %v391_v2, 0.0  ;;  %v440_v9 = vmax.f32 %v432_v3, 0.0  ;;  %v2827_v62 = vld [vmem:[%s3944_s5 + $0x698] ss:$28 sps:$4 sm:$0xff]   ;;  %v2832_v63 = vld [vmem:[%s3944_s5 + $0x2e4] ss:$28 sps:$4 sm:$0xff]  }
 0x1ac   :  { %v394_v10 = vpop.f32.mrf.mxu1  ;;  %v435_v11 = vpop.f32.mrf.mxu0  ;;  %v2833_v2 = vld [vmem:[%s3944_s5 + $0x660] ss:$28 sps:$4 sm:$0xff]   ;;  %v2838_v3 = vld [vmem:[%s3944_s5 + $0x2ac] ss:$28 sps:$4 sm:$0xff]  }
 0x1ad   :  { %v439_v12 = vmax.f32 %v393_v6, 0.0  ;;  %v441_v13 = vmax.f32 %v434_v7, 0.0  ;;  %v3425_v20 = vpack.c.bf16 %v438_v8, %v438_v8  ;;  %v3427_v21 = vpack.c.bf16 %v440_v9, %v440_v9  ;;  %v2841_v4 = vld [vmem:[%s3944_s5 + $0x62c] ss:$28 sps:$4 sm:$0xff]   ;;  %v2844_v7 = vld [vmem:[%s3944_s5 + $0x274] ss:$28 sps:$4 sm:$0xff]  }
 0x1ae   :  { %v395_v14 = vpop.f32.mrf.mxu1  ;;  %v436_v15 = vpop.f32.mrf.mxu0  ;;  %v2836_v5 = vld [vmem:[%s3944_s5 + $0x2a8] ss:$28 sps:$4 sm:$0xff]   ;;  %v2847_v8 = vld [vmem:[%s3944_s5 + $0x5f4] ss:$28 sps:$4 sm:$0xff]   ;;  %v2850_v11 = vld [vmem:[%s3944_s5 + $0x23c] ss:$28 sps:$4 sm:$0xff]  }
 0x1af   :  { %v3415_v16 = vpack.c.bf16 %v439_v12, %v439_v12  ;;  %v3417_v17 = vpack.c.bf16 %v441_v13, %v441_v13  ;;  %v2839_v6 = vld [vmem:[%s3944_s5 + $0x628] ss:$28 sps:$4 sm:$0xff]   ;;  %v2842_v9 = vld [vmem:[%s3944_s5 + $0x270] ss:$28 sps:$4 sm:$0xff]   ;;  %v2853_v12 = vld [vmem:[%s3944_s5 + $0x5bc] ss:$28 sps:$4 sm:$0xff]  }
 0x1b0   :  { %v2845_v10 = vld [vmem:[%s3944_s5 + $0x5f0] ss:$28 sps:$4 sm:$0xff]   ;;  %v2848_v13 = vld [vmem:[%s3944_s5 + $0x238] ss:$28 sps:$4 sm:$0xff]   ;;  %v2856_v15 = vld [vmem:[%s3944_s5 + $0x204] ss:$28 sps:$4 sm:$0xff]  }
 0x1b1   :  { %1923 = vmatprep.mubr.bf16.mxu1 %v3415_v16  ;;  %1964 = vmatprep.mubr.bf16.mxu0 %v3417_v17  ;;  %v2851_v14 = vld [vmem:[%s3944_s5 + $0x5b8] ss:$28 sps:$4 sm:$0xff]  }
 0x1b2   :  { %1924 = vmatmul.mubr.bf16.vlgmr.msra.gmra.mxu1 %v3425_v20  ;;  %1965 = vmatmul.mubr.bf16.vlgmr.msra.gmra.mxu0 %v3427_v21 }
 0x1b3   :  { %1974 = vmatpush1.bf16.msra.mxu1 %v2770_v18  ;;  %2015 = vmatpush1.bf16.msra.mxu0 %v2773_v19  ;;  %v2859_v18 = vld [vmem:[%s3944_s5 + $0x584] ss:$28 sps:$4 sm:$0xff]  }
 0x1b4   :  { %2005 = vmatprep.mubr.bf16.mxu1 %v3415_v16  ;;  %2046 = vmatprep.mubr.bf16.mxu0 %v3417_v17  ;;  %v2854_v19 = vld [vmem:[%s3944_s5 + $0x200] ss:$28 sps:$4 sm:$0xff]  }
 0x1b5   :  { %1975 = vmatprep.subr.bf16.mxu1 %v2778_v22  ;;  %2016 = vmatprep.subr.bf16.mxu0 %v2781_v23  ;;  %v2857_v22 = vld [vmem:[%s3944_s5 + $0x580] ss:$28 sps:$4 sm:$0xff]   ;;  %v2862_v23 = vld [vmem:[%s3944_s5 + $0x1cc] ss:$28 sps:$4 sm:$0xff]  }
 0x1b7   :  { %1976 = vmatpush1.bf16.msra.mxu1 %v2776_v24  ;;  %2017 = vmatpush1.bf16.msra.mxu0 %v2779_v25  ;;  %v2865_v24 = vld [vmem:[%s3944_s5 + $0x54c] ss:$28 sps:$4 sm:$0xff]  }
 0x1b8   :  { %1977 = vmatprep.subr.bf16.mxu1 %v2784_v26  ;;  %2018 = vmatprep.subr.bf16.mxu0 %v2787_v27  ;;  %v2860_v25 = vld [vmem:[%s3944_s5 + $0x1c8] ss:$28 sps:$4 sm:$0xff]   ;;  %v2868_v27 = vld [vmem:[%s3944_s5 + $0x19c] ss:$28 sps:$4 sm:$0xff]  }
 0x1b9   :  { %v2863_v26 = vld [vmem:[%s3944_s5 + $0x548] ss:$28 sps:$4 sm:$0xff]  }
 0x1bb   :  { %1978 = vmatpush1.bf16.msra.mxu1 %v2782_v28  ;;  %2019 = vmatpush1.bf16.msra.mxu0 %v2785_v29  ;;  %v2871_v28 = vld [vmem:[%s3944_s5 + $0x51c] ss:$28 sps:$4 sm:$0xff]  }
 0x1bc   :  { %1979 = vmatprep.subr.bf16.mxu1 %v2790_v30  ;;  %2020 = vmatprep.subr.bf16.mxu0 %v2793_v31  ;;  %v2866_v29 = vld [vmem:[%s3944_s5 + $0x198] ss:$28 sps:$4 sm:$0xff]   ;;  %v2874_v31 = vld [vmem:[%s3944_s5 + $0x164] ss:$28 sps:$4 sm:$0xff]  }
 0x1bd   :  { %v2869_v30 = vld [vmem:[%s3944_s5 + $0x518] ss:$28 sps:$4 sm:$0xff]  }
 0x1bf   :  { %1980 = vmatpush1.bf16.msra.mxu1 %v2788_v32  ;;  %2021 = vmatpush1.bf16.msra.mxu0 %v2791_v33  ;;  %v2877_v32 = vld [vmem:[%s3944_s5 + $0x4e4] ss:$28 sps:$4 sm:$0xff]  }
 0x1c0   :  { %1981 = vmatprep.subr.bf16.mxu1 %v2796_v34  ;;  %2022 = vmatprep.subr.bf16.mxu0 %v2799_v35  ;;  %v2872_v33 = vld [vmem:[%s3944_s5 + $0x160] ss:$28 sps:$4 sm:$0xff]   ;;  %v2880_v35 = vld [vmem:[%s3944_s5 + $0x12c] ss:$28 sps:$4 sm:$0xff]  }
 0x1c1   :  { %v2875_v34 = vld [vmem:[%s3944_s5 + $0x4e0] ss:$28 sps:$4 sm:$0xff]  }
 0x1c3   :  { %1982 = vmatpush1.bf16.msra.mxu1 %v2794_v36  ;;  %2023 = vmatpush1.bf16.msra.mxu0 %v2797_v37  ;;  %v2883_v36 = vld [vmem:[%s3944_s5 + $0x4ac] ss:$28 sps:$4 sm:$0xff]  }
 0x1c4   :  { %1983 = vmatprep.subr.bf16.mxu1 %v2802_v38  ;;  %2024 = vmatprep.subr.bf16.mxu0 %v2805_v39  ;;  %v2878_v37 = vld [vmem:[%s3944_s5 + $0x128] ss:$28 sps:$4 sm:$0xff]   ;;  %v2886_v39 = vld [vmem:[%s3944_s5 + $0xf4] ss:$28 sps:$4 sm:$0xff]  }
 0x1c5   :  { %v2881_v38 = vld [vmem:[%s3944_s5 + $0x4a8] ss:$28 sps:$4 sm:$0xff]  }
 0x1c7   :  { %1984 = vmatpush1.bf16.msra.mxu1 %v2800_v40  ;;  %2025 = vmatpush1.bf16.msra.mxu0 %v2803_v41  ;;  %v2889_v40 = vld [vmem:[%s3944_s5 + $0x474] ss:$28 sps:$4 sm:$0xff]  }
 0x1c8   :  { %1985 = vmatprep.subr.bf16.mxu1 %v2808_v42  ;;  %2026 = vmatprep.subr.bf16.mxu0 %v2811_v43  ;;  %v2884_v41 = vld [vmem:[%s3944_s5 + $0xf0] ss:$28 sps:$4 sm:$0xff]   ;;  %v2892_v43 = vld [vmem:[%s3944_s5 + $0xbc] ss:$28 sps:$4 sm:$0xff]  }
 0x1c9   :  { %v2887_v42 = vld [vmem:[%s3944_s5 + $0x470] ss:$28 sps:$4 sm:$0xff]  }
 0x1cb   :  { %1986 = vmatpush1.bf16.msra.mxu1 %v2806_v44  ;;  %2027 = vmatpush1.bf16.msra.mxu0 %v2809_v45  ;;  %v2895_v44 = vld [vmem:[%s3944_s5 + $0x43c] ss:$28 sps:$4 sm:$0xff]  }
 0x1cc   :  { %1987 = vmatprep.subr.bf16.mxu1 %v2814_v46  ;;  %2028 = vmatprep.subr.bf16.mxu0 %v2817_v47  ;;  %v2890_v45 = vld [vmem:[%s3944_s5 + $0xb8] ss:$28 sps:$4 sm:$0xff]   ;;  %v2898_v47 = vld [vmem:[%s3944_s5 + $0x84] ss:$28 sps:$4 sm:$0xff]  }
 0x1cd   :  { %v2893_v46 = vld [vmem:[%s3944_s5 + $0x438] ss:$28 sps:$4 sm:$0xff]  }
 0x1cf   :  { %1988 = vmatpush1.bf16.msra.mxu1 %v2812_v48  ;;  %2029 = vmatpush1.bf16.msra.mxu0 %v2815_v49  ;;  %v2901_v48 = vld [vmem:[%s3944_s5 + $0x404] ss:$28 sps:$4 sm:$0xff]  }
 0x1d0   :  { %1989 = vmatprep.subr.bf16.mxu1 %v2820_v50  ;;  %2030 = vmatprep.subr.bf16.mxu0 %v2823_v51  ;;  %v2896_v49 = vld [vmem:[%s3944_s5 + $0x80] ss:$28 sps:$4 sm:$0xff]   ;;  %v2904_v51 = vld [vmem:[%s3944_s5 + $0x4c] ss:$28 sps:$4 sm:$0xff]  }
 0x1d1   :  { %v2899_v50 = vld [vmem:[%s3944_s5 + $0x400] ss:$28 sps:$4 sm:$0xff]  }
 0x1d3   :  { %1990 = vmatpush2.bf16.msra.mxu1 %v2818_v52  ;;  %2031 = vmatpush2.bf16.msra.mxu0 %v2821_v53  ;;  %v2907_v52 = vld [vmem:[%s3944_s5 + $0x3cc] ss:$28 sps:$4 sm:$0xff]  }
 0x1d4   :  { %1991 = vmatprep.subr.bf16.mxu1 %v2826_v57  ;;  %2032 = vmatprep.subr.bf16.mxu0 %v2829_v60  ;;  %v2902_v53 = vld [vmem:[%s3944_s5 + $0x48] ss:$28 sps:$4 sm:$0xff]   ;;  %v2910_v60 = vld [vmem:[%s3944_s5 + $0x14] ss:$28 sps:$4 sm:$0xff]  }
 0x1d5   :  { %v2905_v57 = vld [vmem:[%s3944_s5 + $0x3c8] ss:$28 sps:$4 sm:$0xff]  }
 0x1d7   :  { %1992 = vmatpush2.bf16.msra.mxu1 %v2824_v61  ;;  %2033 = vmatpush2.bf16.msra.mxu0 %v2827_v62  ;;  %v2913_v61 = vld [vmem:[%s3944_s5 + $0x394] ss:$28 sps:$4 sm:$0xff]  }
 0x1d8   :  { %1993 = vmatprep.subr.bf16.mxu1 %v2832_v63  ;;  %2034 = vmatprep.subr.bf16.mxu0 %v2835_v0  ;;  %v2908_v62 = vld [vmem:[%s3944_s5 + $0x10] ss:$28 sps:$4 sm:$0xff]   ;;  %v2916_v0 = vld [vmem:[%s3944_s5 + $0x35c] ss:$28 sps:$4 sm:$0xff]  }
 0x1d9   :  { %v2911_v63 = vld [vmem:[%s3944_s5 + $0x390] ss:$28 sps:$4 sm:$0xff]  }
 0x1db   :  { %1994 = vmatpush2.bf16.msra.mxu1 %v2830_v1  ;;  %2035 = vmatpush2.bf16.msra.mxu0 %v2833_v2  ;;  %v2919_v1 = vld [vmem:[%s3944_s5 + $0x6dc] ss:$28 sps:$4 sm:$0xff]  }
 0x1dc   :  { %1995 = vmatprep.subr.bf16.mxu1 %v2838_v3  ;;  %2036 = vmatprep.subr.bf16.mxu0 %v2841_v4  ;;  %v2914_v2 = vld [vmem:[%s3944_s5 + $0x358] ss:$28 sps:$4 sm:$0xff]   ;;  %v2922_v4 = vld [vmem:[%s3944_s5 + $0x324] ss:$28 sps:$4 sm:$0xff]  }
 0x1dd   :  { %v2917_v3 = vld [vmem:[%s3944_s5 + $0x6d8] ss:$28 sps:$4 sm:$0xff]  }
 0x1df   :  { %1996 = vmatpush2.bf16.msra.mxu1 %v2836_v5  ;;  %2037 = vmatpush2.bf16.msra.mxu0 %v2839_v6  ;;  %v2925_v5 = vld [vmem:[%s3944_s5 + $0x6a4] ss:$28 sps:$4 sm:$0xff]  }
 0x1e0   :  { %1997 = vmatprep.subr.bf16.mxu1 %v2844_v7  ;;  %2038 = vmatprep.subr.bf16.mxu0 %v2847_v8  ;;  %v2920_v6 = vld [vmem:[%s3944_s5 + $0x320] ss:$28 sps:$4 sm:$0xff]   ;;  %v2928_v8 = vld [vmem:[%s3944_s5 + $0x2ec] ss:$28 sps:$4 sm:$0xff]  }
 0x1e1   :  { %v2923_v7 = vld [vmem:[%s3944_s5 + $0x6a0] ss:$28 sps:$4 sm:$0xff]  }
 0x1e3   :  { %1998 = vmatpush2.bf16.msra.mxu1 %v2842_v9  ;;  %2039 = vmatpush2.bf16.msra.mxu0 %v2845_v10  ;;  %v2931_v9 = vld [vmem:[%s3944_s5 + $0x66c] ss:$28 sps:$4 sm:$0xff]  }
 0x1e4   :  { %1999 = vmatprep.subr.bf16.mxu1 %v2850_v11  ;;  %2040 = vmatprep.subr.bf16.mxu0 %v2853_v12  ;;  %v2926_v10 = vld [vmem:[%s3944_s5 + $0x2e8] ss:$28 sps:$4 sm:$0xff]   ;;  %v2934_v12 = vld [vmem:[%s3944_s5 + $0x2b4] ss:$28 sps:$4 sm:$0xff]  }
 0x1e5   :  { %v2929_v11 = vld [vmem:[%s3944_s5 + $0x668] ss:$28 sps:$4 sm:$0xff]  }
 0x1e7   :  { %2000 = vmatpush2.bf16.msra.mxu1 %v2848_v13  ;;  %2041 = vmatpush2.bf16.msra.mxu0 %v2851_v14  ;;  %v2937_v13 = vld [vmem:[%s3944_s5 + $0x634] ss:$28 sps:$4 sm:$0xff]  }
 0x1e8   :  { %2001 = vmatprep.subr.bf16.mxu1 %v2856_v15  ;;  %2042 = vmatprep.subr.bf16.mxu0 %v2859_v18  ;;  %v2932_v14 = vld [vmem:[%s3944_s5 + $0x2b0] ss:$28 sps:$4 sm:$0xff]   ;;  %v2940_v18 = vld [vmem:[%s3944_s5 + $0x27c] ss:$28 sps:$4 sm:$0xff]  }
 0x1e9   :  { %v2935_v15 = vld [vmem:[%s3944_s5 + $0x630] ss:$28 sps:$4 sm:$0xff]  }
 0x1eb   :  { %2002 = vmatpush2.bf16.msra.mxu1 %v2854_v19  ;;  %2043 = vmatpush2.bf16.msra.mxu0 %v2857_v22  ;;  %v2943_v19 = vld [vmem:[%s3944_s5 + $0x5fc] ss:$28 sps:$4 sm:$0xff]  }
 0x1ec   :  { %2003 = vmatprep.subr.bf16.mxu1 %v2862_v23  ;;  %2044 = vmatprep.subr.bf16.mxu0 %v2865_v24  ;;  %v2938_v22 = vld [vmem:[%s3944_s5 + $0x278] ss:$28 sps:$4 sm:$0xff]   ;;  %v2946_v24 = vld [vmem:[%s3944_s5 + $0x244] ss:$28 sps:$4 sm:$0xff]  }
 0x1ed   :  { %v2941_v23 = vld [vmem:[%s3944_s5 + $0x5f8] ss:$28 sps:$4 sm:$0xff]  }
 0x1ef   :  { %2004 = vmatpush2.bf16.msra.mxu1 %v2860_v25  ;;  %2045 = vmatpush2.bf16.msra.mxu0 %v2863_v26  ;;  %v2949_v25 = vld [vmem:[%s3944_s5 + $0x5c4] ss:$28 sps:$4 sm:$0xff]  }
 0x1f0   :  { %2055 = vmatprep.subr.bf16.mxu1 %v2868_v27  ;;  %2096 = vmatprep.subr.bf16.mxu0 %v2871_v28  ;;  %v2944_v26 = vld [vmem:[%s3944_s5 + $0x240] ss:$28 sps:$4 sm:$0xff]   ;;  %v2952_v28 = vld [vmem:[%s3944_s5 + $0x20c] ss:$28 sps:$4 sm:$0xff]  }
 0x1f1   :  { %v2947_v27 = vld [vmem:[%s3944_s5 + $0x5c0] ss:$28 sps:$4 sm:$0xff]  }
 0x1f2   :  { %2006 = vmatmul.mubr.bf16.vlgmr.msra.gmra.mxu1 %v3425_v20  ;;  %2047 = vmatmul.mubr.bf16.vlgmr.msra.gmra.mxu0 %v3427_v21 }
 0x1f3   :  { %2056 = vmatpush1.bf16.msra.mxu1 %v2866_v29  ;;  %2087 = vmatprep.mubr.bf16.mxu1 %v3415_v16  ;;  %v2955_v29 = vld [vmem:[%s3944_s5 + $0x58c] ss:$28 sps:$4 sm:$0xff]  }
 0x1f4   :  { %2097 = vmatpush1.bf16.msra.mxu0 %v2869_v30  ;;  %2128 = vmatprep.mubr.bf16.mxu0 %v3417_v17  ;;  %v2950_v30 = vld [vmem:[%s3944_s5 + $0x208] ss:$28 sps:$4 sm:$0xff]  }
 0x1f5   :  { %2057 = vmatprep.subr.bf16.mxu1 %v2874_v31  ;;  %2098 = vmatprep.subr.bf16.mxu0 %v2877_v32  ;;  %v2953_v31 = vld [vmem:[%s3944_s5 + $0x588] ss:$28 sps:$4 sm:$0xff]   ;;  %v2958_v32 = vld [vmem:[%s3944_s5 + $0x1d4] ss:$28 sps:$4 sm:$0xff]  }
 0x1f7   :  { %2058 = vmatpush1.bf16.msra.mxu1 %v2872_v33  ;;  %v2961_v33 = vld [vmem:[%s3944_s5 + $0x554] ss:$28 sps:$4 sm:$0xff]  }
 0x1f8   :  { %2099 = vmatpush1.bf16.msra.mxu0 %v2875_v34  ;;  %2059 = vmatprep.subr.bf16.mxu1 %v2880_v35  ;;  %v2956_v34 = vld [vmem:[%s3944_s5 + $0x1d0] ss:$28 sps:$4 sm:$0xff]  }
 0x1f9   :  { %2100 = vmatprep.subr.bf16.mxu0 %v2883_v36  ;;  %v2959_v35 = vld [vmem:[%s3944_s5 + $0x550] ss:$28 sps:$4 sm:$0xff]   ;;  %v2962_v36 = vld [vmem:[%s3944_s5 + $0x360] ss:$28 sps:$4 sm:$0xff]  }
 0x1fb   :  { %2060 = vmatpush1.bf16.msra.mxu1 %v2878_v37  ;;  %v2963_v37 = vld [vmem:[%s3944_s5 + $0x6e0] ss:$28 sps:$4 sm:$0xff]  }
 0x1fc   :  { %2101 = vmatpush1.bf16.msra.mxu0 %v2881_v38  ;;  %2061 = vmatprep.subr.bf16.mxu1 %v2886_v39  ;;  %v2964_v38 = vld [vmem:[%s3944_s5 + $0x1a0] ss:$28 sps:$4 sm:$0xff]  }
 0x1fd   :  { %2102 = vmatprep.subr.bf16.mxu0 %v2889_v40  ;;  %v2965_v39 = vld [vmem:[%s3944_s5 + $0x520] ss:$28 sps:$4 sm:$0xff]   ;;  %v2966_v40 = vld [vmem:[%s3944_s5 + $0x328] ss:$28 sps:$4 sm:$0xff]  }
 0x1ff   :  { %2062 = vmatpush1.bf16.msra.mxu1 %v2884_v41  ;;  %v2967_v41 = vld [vmem:[%s3944_s5 + $0x6a8] ss:$28 sps:$4 sm:$0xff]  }
 0x200   :  { %2103 = vmatpush1.bf16.msra.mxu0 %v2887_v42  ;;  %2063 = vmatprep.subr.bf16.mxu1 %v2892_v43  ;;  %v2968_v42 = vld [vmem:[%s3944_s5 + $0x168] ss:$28 sps:$4 sm:$0xff]  }
 0x201   :  { %2104 = vmatprep.subr.bf16.mxu0 %v2895_v44  ;;  %v2969_v43 = vld [vmem:[%s3944_s5 + $0x4e8] ss:$28 sps:$4 sm:$0xff]   ;;  %v2970_v44 = vld [vmem:[%s3944_s5 + $0x2f0] ss:$28 sps:$4 sm:$0xff]  }
 0x203   :  { %2064 = vmatpush1.bf16.msra.mxu1 %v2890_v45  ;;  %v2971_v45 = vld [vmem:[%s3944_s5 + $0x670] ss:$28 sps:$4 sm:$0xff]  }
 0x204   :  { %2105 = vmatpush1.bf16.msra.mxu0 %v2893_v46  ;;  %2065 = vmatprep.subr.bf16.mxu1 %v2898_v47  ;;  %v2973_v46 = vld [vmem:[%s3944_s5 + $0x4b0] ss:$28 sps:$4 sm:$0xff]   ;;  %v2975_v47 = vld [vmem:[%s3944_s5 + $0x638] ss:$28 sps:$4 sm:$0xff]  }
 0x205   :  { %2106 = vmatprep.subr.bf16.mxu0 %v2901_v48  ;;  %v2976_v48 = vld [vmem:[%s3944_s5 + $0xf8] ss:$28 sps:$4 sm:$0xff]  }
 0x207   :  { %2066 = vmatpush1.bf16.msra.mxu1 %v2896_v49  ;;  %v2977_v49 = vld [vmem:[%s3944_s5 + $0x478] ss:$28 sps:$4 sm:$0xff]  }
 0x208   :  { %2107 = vmatpush1.bf16.msra.mxu0 %v2899_v50  ;;  %2067 = vmatprep.subr.bf16.mxu1 %v2904_v51  ;;  %v2978_v50 = vld [vmem:[%s3944_s5 + $0x280] ss:$28 sps:$4 sm:$0xff]  }
 0x209   :  { %2108 = vmatprep.subr.bf16.mxu0 %v2907_v52  ;;  %v2979_v51 = vld [vmem:[%s3944_s5 + $0x600] ss:$28 sps:$4 sm:$0xff]  }
 0x20a   :  { %v2980_v52 = vld [vmem:[%s3944_s5 + $0xc0] ss:$28 sps:$4 sm:$0xff]  }
 0x20b   :  { %2068 = vmatpush1.bf16.msra.mxu1 %v2902_v53  ;;  %v2981_v53 = vld [vmem:[%s3944_s5 + $0x440] ss:$28 sps:$4 sm:$0xff]  }
 0x20c   :  { %2109 = vmatpush1.bf16.msra.mxu0 %v2905_v57  ;;  %2069 = vmatprep.subr.bf16.mxu1 %v2910_v60  ;;  %v2982_v57 = vld [vmem:[%s3944_s5 + $0x248] ss:$28 sps:$4 sm:$0xff]  }
 0x20d   :  { %2110 = vmatprep.subr.bf16.mxu0 %v2913_v61  ;;  %v2983_v60 = vld [vmem:[%s3944_s5 + $0x5c8] ss:$28 sps:$4 sm:$0xff]  }
 0x20e   :  { %v2984_v61 = vld [vmem:[%s3944_s5 + $0x88] ss:$28 sps:$4 sm:$0xff]  }
 0x20f   :  { %2070 = vmatpush1.bf16.msra.mxu1 %v2908_v62  ;;  %v2985_v62 = vld [vmem:[%s3944_s5 + $0x408] ss:$28 sps:$4 sm:$0xff]  }
 0x210   :  { %2111 = vmatpush1.bf16.msra.mxu0 %v2911_v63  ;;  %2071 = vmatprep.subr.bf16.mxu1 %v2916_v0  ;;  %v2986_v63 = vld [vmem:[%s3944_s5 + $0x210] ss:$28 sps:$4 sm:$0xff]  }
 0x211   :  { %2112 = vmatprep.subr.bf16.mxu0 %v2919_v1  ;;  %v2987_v0 = vld [vmem:[%s3944_s5 + $0x590] ss:$28 sps:$4 sm:$0xff]  }
 0x212   :  { %v2988_v1 = vld [vmem:[%s3944_s5 + $0x50] ss:$28 sps:$4 sm:$0xff]  }
 0x213   :  { %2072 = vmatpush2.bf16.msra.mxu1 %v2914_v2  ;;  %v2989_v2 = vld [vmem:[%s3944_s5 + $0x3d0] ss:$28 sps:$4 sm:$0xff]  }
 0x214   :  { %2113 = vmatpush2.bf16.msra.mxu0 %v2917_v3  ;;  %2073 = vmatprep.subr.bf16.mxu1 %v2922_v4  ;;  %v2990_v3 = vld [vmem:[%s3944_s5 + $0x1d8] ss:$28 sps:$4 sm:$0xff]  }
 0x215   :  { %2114 = vmatprep.subr.bf16.mxu0 %v2925_v5  ;;  %v2991_v4 = vld [vmem:[%s3944_s5 + $0x558] ss:$28 sps:$4 sm:$0xff]  }
 0x216   :  { %v2992_v5 = vld [vmem:[%s3944_s5 + $0x18] ss:$28 sps:$4 sm:$0xff]  }
 0x217   :  { %2074 = vmatpush2.bf16.msra.mxu1 %v2920_v6  ;;  %v2993_v6 = vld [vmem:[%s3944_s5 + $0x398] ss:$28 sps:$4 sm:$0xff]  }
 0x218   :  { %2115 = vmatpush2.bf16.msra.mxu0 %v2923_v7  ;;  %2075 = vmatprep.subr.bf16.mxu1 %v2928_v8  ;;  %v3916_v7 = vld [vmem:[%s3945_s6] sm:$0x7f] }
 0x219   :  { %2116 = vmatprep.subr.bf16.mxu0 %v2931_v9  ;;  %v707_v8 = vrot.slane %v3916_v7, %v178_v55  ;;  %v711_v9 = vrot.slane %v3916_v7, %v182_v58  ;;  %v715_v58 = vrot.slane %v3916_v7, %v186_v56 }
 0x21b   :  { %2076 = vmatpush2.bf16.msra.mxu1 %v2926_v10 }
 0x21c   :  { %2117 = vmatpush2.bf16.msra.mxu0 %v2929_v11  ;;  %2077 = vmatprep.subr.bf16.mxu1 %v2934_v12 }
 0x21d   :  { %2118 = vmatprep.subr.bf16.mxu0 %v2937_v13 }
 0x21f   :  { %2078 = vmatpush2.bf16.msra.mxu1 %v2932_v14 }
 0x220   :  { %2119 = vmatpush2.bf16.msra.mxu0 %v2935_v15  ;;  %2079 = vmatprep.subr.bf16.mxu1 %v2940_v18 }
 0x221   :  { %2120 = vmatprep.subr.bf16.mxu0 %v2943_v19 }
 0x223   :  { %2080 = vmatpush2.bf16.msra.mxu1 %v2938_v22 }
 0x224   :  { %2121 = vmatpush2.bf16.msra.mxu0 %v2941_v23  ;;  %2081 = vmatprep.subr.bf16.mxu1 %v2946_v24 }
 0x225   :  { %2122 = vmatprep.subr.bf16.mxu0 %v2949_v25 }
 0x227   :  { %2082 = vmatpush2.bf16.msra.mxu1 %v2944_v26 }
 0x228   :  { %2123 = vmatpush2.bf16.msra.mxu0 %v2947_v27  ;;  %2083 = vmatprep.subr.bf16.mxu1 %v2952_v28  ;;  %v719_v28 = vrot.slane %v3916_v7, %v190_v59  ;;  %v722_v59 = vsub.s32 4, %v3398_v54 }
 0x229   :  { %2124 = vmatprep.subr.bf16.mxu0 %v2955_v29 }
 0x22b   :  { %2084 = vmatpush2.bf16.msra.mxu1 %v2950_v30 }
 0x22c   :  { %2125 = vmatpush2.bf16.msra.mxu0 %v2953_v31  ;;  %2085 = vmatprep.subr.bf16.mxu1 %v2958_v32 }
 0x22d   :  { %2126 = vmatprep.subr.bf16.mxu0 %v2961_v33 }
 0x22f   :  { %2086 = vmatpush2.bf16.msra.mxu1 %v2956_v34 }
 0x230   :  { %2127 = vmatpush2.bf16.msra.mxu0 %v2959_v35  ;;  %2550 = vmatprep.subr.bf16.mxu1 %v2962_v36 }
 0x231   :  { %2572 = vmatprep.subr.bf16.mxu0 %v2963_v37 }
 0x232   :  { %2088 = vmatmul.mubr.bf16.vlgmr.msra.gmra.mxu1 %v3425_v20 }
 0x233   :  { %2129 = vmatmul.mubr.bf16.vlgmr.msra.gmra.mxu0 %v3427_v21  ;;  %2551 = vmatpush3.bf16.msra.mxu1 %v2964_v38 }
 0x234   :  { %2169 = vmatprep.mubr.bf16.mxu1 %v3415_v16  ;;  %2573 = vmatpush3.bf16.msra.mxu0 %v2965_v39  ;;  %v2972_v16 = vld [vmem:[%s3944_s5 + $0x130] ss:$28 sps:$4 sm:$0xff]  }
 0x235   :  { %2209 = vmatprep.mubr.bf16.mxu0 %v3417_v17  ;;  %2552 = vmatprep.subr.bf16.mxu1 %v2966_v40  ;;  %v2974_v17 = vld [vmem:[%s3944_s5 + $0x2b8] ss:$28 sps:$4 sm:$0xff]   ;;  %s3033_s5 = smov [#allocation2]  }
 0x236   :  { %2574 = vmatprep.subr.bf16.mxu0 %v2967_v41  ;;  %s2264_s6 = sshll.u32 %s3033_s5, 4  ;;  %s2265_s6 = int_to_ptr.vmem [resolvable:$true] %s2264_s6 }
 0x237   :  { %2553 = vmatpush3.bf16.msra.mxu1 %v2968_v42  ;;  %s3008_s19 = scalar_lea.vmem %s2265_s6, 448  ;;  %p3013_p1 = scmp.lt.s32.totalorder %s2265_s6, %s2265_s6 }
 0x238   :  { %2575 = vmatpush3.bf16.msra.mxu0 %v2969_v43  ;;  %2554 = vmatprep.subr.bf16.mxu1 %v2970_v44  ;;  %p3009_p0 = scmp.ne.s32.totalorder %s2265_s6, %s3008_s19  ;;  %p3014_p2 = scmp.lt.s32.totalorder %s3008_s19, %s3008_s19 }
 0x239   :  { %2576 = vmatprep.subr.bf16.mxu0 %v2971_v45  ;;  %v726_v45 = vsub.s32 5, %v3398_v54 }
 0x23a   :  { %p3015_p3 = por %p3014_p2, %p3013_p1 }
 0x23b   :  { %2555 = vmatpush3.bf16.msra.mxu1 %v2972_v16  ;;  %v723_v16 = vrot.slane %v3916_v7, %v722_v59 }
 0x23c   :  { %2577 = vmatpush3.bf16.msra.mxu0 %v2973_v46  ;;  %2556 = vmatprep.subr.bf16.mxu1 %v2974_v17  ;;  %v727_v46 = vrot.slane %v3916_v7, %v726_v45  ;;  %p3016_p4 = pnand %p3015_p3, %p3009_p0 }
 0x23d   :  { %2578 = vmatprep.subr.bf16.mxu0 %v2975_v47 }
 0x23f   :  { %2557 = vmatpush3.bf16.msra.mxu1 %v2976_v48 }
 0x240   :  { %2579 = vmatpush3.bf16.msra.mxu0 %v2977_v49  ;;  %2558 = vmatprep.subr.bf16.mxu1 %v2978_v50 }
 0x241   :  { %2580 = vmatprep.subr.bf16.mxu0 %v2979_v51 }
 0x243   :  { %2559 = vmatpush3.bf16.msra.mxu1 %v2980_v52 }
 0x244   :  { %2581 = vmatpush3.bf16.msra.mxu0 %v2981_v53  ;;  %2560 = vmatprep.subr.bf16.mxu1 %v2982_v57 }
 0x245   :  { %2582 = vmatprep.subr.bf16.mxu0 %v2983_v60 }
 0x247   :  { %2561 = vmatpush3.bf16.msra.mxu1 %v2984_v61 }
 0x248   :  { %2583 = vmatpush3.bf16.msra.mxu0 %v2985_v62  ;;  %2562 = vmatprep.subr.bf16.mxu1 %v2986_v63 }
 0x249   :  { %2584 = vmatprep.subr.bf16.mxu0 %v2987_v0 }
 0x24b   :  { %2563 = vmatpush3.bf16.msra.mxu1 %v2988_v1 }
 0x24c   :  { %2585 = vmatpush3.bf16.msra.mxu0 %v2989_v2  ;;  %2564 = vmatprep.subr.bf16.mxu1 %v2990_v3 }
 0x24d   :  { %2586 = vmatprep.subr.bf16.mxu0 %v2991_v4  ;;  %v730_v4 = vsub.s32 6, %v3398_v54 }
 0x24f   :  { %2565 = vmatpush3.bf16.msra.mxu1 %v2992_v5 }
 0x250   :  { %2587 = vmatpush3.bf16.msra.mxu0 %v2993_v6 }
 0x252   :  { %2170 = vmatmul.mubr.bf16.vlgmr.msra.gmra.mxu1 %v3425_v20 }
 0x253   :  { %2210 = vmatmul.mubr.bf16.vlgmr.msra.gmra.mxu0 %v3427_v21 }
 0x272   :  { %v1925_v10 = vpop.f32.mrf.mxu1  ;;  %v1966_v11 = vpop.f32.mrf.mxu0 }
 0x273   :  { %v1926_v12 = vadd.f32 %v1925_v10, %v707_v8  ;;  %v731_v8 = vrot.slane %v3916_v7, %v730_v4 }
 0x274   :  { %v1927_v13 = vpop.f32.mrf.mxu1  ;;  %v1968_v20 = vpop.f32.mrf.mxu0 }
 0x275   :  { %v1967_v14 = vadd.f32 %v1966_v11, %v1926_v12  ;;  %v1928_v21 = vadd.f32 %v1927_v13, %v711_v9 }
 0x276   :  { %v1929_v15 = vpop.f32.mrf.mxu1  ;;  %v1970_v18 = vpop.f32.mrf.mxu0 }
 0x277   :  { %v2217_v19 = vpack.c.bf16 %v1967_v14, %v1967_v14  ;;  %v1969_v22 = vadd.f32 %v1968_v20, %v1928_v21 }
 0x278   :  { %v1930_v23 = vpop.f32.mrf.mxu1  ;;  %v1971_v24 = vpop.f32.mrf.mxu0 }
 0x279   :  { %v2218_v25 = vpack.c.bf16 %v1969_v22, %v1969_v22  ;;  %2994 = vtanh.bf16 %v2217_v19 }
 0x27b   :  { %2996 = vtanh.bf16 %v2218_v25 }
 0x287   :  { %v2995_v55 = vpop.eup %2994 }
 0x289   :  { %v2997_v26 = vpop.eup %2996 }
 0x28a   :  { %v2537_v27 = vcombine.low %v2995_v55, %v2997_v26 }
 0x28c   :  { %2253 = vst [vmem:[#allocation2] sm:$0xff] %v2537_v27 }
 0x2b2   :  { %v2007_v29 = vpop.f32.mrf.mxu1  ;;  %v2048_v30 = vpop.f32.mrf.mxu0 }
 0x2b3   :  { %v2008_v31 = vadd.f32 %v2007_v29, %v715_v58 }
 0x2b4   :  { %v2009_v32 = vpop.f32.mrf.mxu1  ;;  %v2050_v33 = vpop.f32.mrf.mxu0 }
 0x2b5   :  { %v2049_v34 = vadd.f32 %v2048_v30, %v2008_v31  ;;  %v2010_v35 = vadd.f32 %v2009_v32, %v719_v28 }
 0x2b6   :  { %v2011_v36 = vpop.f32.mrf.mxu1  ;;  %v2052_v37 = vpop.f32.mrf.mxu0 }
 0x2b7   :  { %v2219_v38 = vpack.c.bf16 %v2049_v34, %v2049_v34  ;;  %v2051_v39 = vadd.f32 %v2050_v33, %v2010_v35 }
 0x2b8   :  { %v2012_v40 = vpop.f32.mrf.mxu1  ;;  %v2053_v41 = vpop.f32.mrf.mxu0 }
 0x2b9   :  { %v2220_v42 = vpack.c.bf16 %v2051_v39, %v2051_v39  ;;  %2998 = vtanh.bf16 %v2219_v38 }
 0x2bb   :  { %3000 = vtanh.bf16 %v2220_v42 }
 0x2c7   :  { %v2999_v56 = vpop.eup %2998 }
 0x2c9   :  { %v3001_v43 = vpop.eup %3000 }
 0x2ca   :  { %v2538_v44 = vcombine.low %v2999_v56, %v3001_v43 }
 0x2cc   :  { %2254 = vst [vmem:[#allocation2 + $0x8] sm:$0xff] %v2538_v44 }
 0x2f2   :  { %v2089_v17 = vpop.f32.mrf.mxu1 }
 0x2f3   :  { %v2090_v47 = vadd.f32 %v2089_v17, %v723_v16  ;;  %v2130_v48 = vpop.f32.mrf.mxu0 }
 0x2f4   :  { %v2091_v49 = vpop.f32.mrf.mxu1 }
 0x2f5   :  { %v2131_v50 = vadd.f32 %v2130_v48, %v2090_v47  ;;  %v2092_v51 = vadd.f32 %v2091_v49, %v727_v46  ;;  %v2132_v52 = vpop.f32.mrf.mxu0 }
 0x2f6   :  { %v2093_v53 = vpop.f32.mrf.mxu1 }
 0x2f7   :  { %v2221_v57 = vpack.c.bf16 %v2131_v50, %v2131_v50  ;;  %v2133_v60 = vadd.f32 %v2132_v52, %v2092_v51  ;;  %v2134_v61 = vpop.f32.mrf.mxu0 }
 0x2f8   :  { %v2094_v62 = vpop.f32.mrf.mxu1 }
 0x2f9   :  { %v2222_v63 = vpack.c.bf16 %v2133_v60, %v2133_v60  ;;  %v2135_v0 = vpop.f32.mrf.mxu0  ;;  %3002 = vtanh.bf16 %v2221_v57 }
 0x2fb   :  { %3004 = vtanh.bf16 %v2222_v63 }
 0x307   :  { %v3003_v1 = vpop.eup %3002 }
 0x309   :  { %v3005_v2 = vpop.eup %3004 }
 0x30a   :  { %v2539_v3 = vcombine.low %v3003_v1, %v3005_v2 }
 0x30c   :  { %2255 = vst [vmem:[#allocation2 + $0x10] sm:$0xff] %v2539_v3 }
 0x312   :  { %v2566_v5 = vpop.f32.mrf.mxu1 }
 0x313   :  { %v2588_v6 = vpop.f32.mrf.mxu0 }
 0x314   :  { %v2567_v9 = vpop.f32.mrf.mxu1 }
 0x315   :  { %v2568_v10 = vadd.f32 %v2567_v9, %v2566_v5  ;;  %v2589_v11 = vpop.f32.mrf.mxu0 }
 0x316   :  { %v2569_v12 = vpop.f32.mrf.mxu1  ;;  %v2590_v20 = vadd.f32 %v2589_v11, %v2588_v6 }
 0x317   :  { %v2172_v13 = vadd.f32 %v2568_v10, %v731_v8  ;;  %v2591_v14 = vpop.f32.mrf.mxu0 }
 0x318   :  { %v2570_v21 = vpop.f32.mrf.mxu1 }
 0x319   :  { %v2212_v15 = vadd.f32 %v2590_v20, %v2172_v13  ;;  %v2592_v18 = vpop.f32.mrf.mxu0 }
 0x31b   :  { %v2223_v19 = vpack.c.bf16 %v2212_v15, %v2212_v15 }
 0x31d   :  { %3006 = vtanh.bf16 %v2223_v19 }
 0x32b   :  { %v3007_v22 = vpop.eup %3006 }
 0x32c   :  { %v2540_v54 = vcombine.low %v3007_v22, %v3007_v22 }
 0x32e   :  { %2257 = vst.msk [vmem:[#allocation2 + $0x18] sm:$0xf] %vm2256_vm1, %v2540_v54 }
 0x32f   :  { %3019 = shalt.err (!%p3016_p4)
}
 0x330   :  { %2267 = dma.vmem_to_hbm [thread:$0]  %s2265_s6, 448, %s3946_s7, [#allocation3]  }
 0x331   :  { %3028 = dma.done.wait [#allocation3], 448  }
 0x332   :  { %3029 = vsyncadd [#allocation3], 4294966848 }
 0x333   :  { %2271 = vsyncpa [#allocation3], 1 }

</bundles_post_ra>
